<compile_context>
chip_gen: v7x
topology: tpu7x:2x2x1
jax: 0.10.0
libtpu: 0.0.40
codegen_flags: <defaults>
</compile_context>

<pallas_src>
import functools

import jax
import jax.numpy as jnp
from jax.experimental import pallas as pl
from jax.experimental.pallas import tpu as pltpu


def _round_up(n: int, m: int) -> int:
    return ((n + m - 1) // m) * m


def _supports_bf16_vpu() -> bool:
    """bf16 elementwise VALU exists on v6e / v7x; keep f32 VPU path elsewhere."""
    try:
        kind = jax.devices()[0].device_kind.lower()
    except Exception:
        return False
    return ("v6" in kind) or ("v7" in kind) or ("tpu7" in kind)


def mlp_kernel(x_ref,
               w1_ref, b1_ref,
               w2_ref, b2_ref,
               w3_ref, b3_ref,
               w4t_ref, b4t_ref,
               out_ref, *, bf16_ew: bool):
    # x: (TILE_B, in_f) bf16
    h = x_ref[...]

    def hidden(h, w_ref, b_ref):
        # bf16 MXU matmul, f32 accumulation.
        y = jnp.dot(h, w_ref[...], preferred_element_type=jnp.float32)
        if bf16_ew:
            # v6e / v7x: bias-add + ReLU in bf16 (halves vreg / vld / vst traffic).
            y = y.astype(jnp.bfloat16) + b_ref[...]
            return jnp.maximum(y, 0.0)
        # v5e-safe f32 elementwise path.
        y = y + b_ref[...]
        return jnp.maximum(y, 0.0).astype(jnp.bfloat16)

    h = hidden(h, w1_ref, b1_ref)   # (TILE_B, 64)
    h = hidden(h, w2_ref, b2_ref)   # (TILE_B, 64)
    h = hidden(h, w3_ref, b3_ref)   # (TILE_B, 16)

    # Final layer, transposed output: logits^T[i, j] = sum_k w4t[i, k] * h[j, k]
    # -> (nc_pad8, TILE_B): class on sublane, batch on the (lane-dense) lane axis.
    logits_t = jax.lax.dot_general(
        w4t_ref[...], h, (((1,), (1,)), ((), ())),
        preferred_element_type=jnp.float32)
    out_ref[...] = (logits_t + b4t_ref[...]).astype(out_ref.dtype)


def _choose_tile_b(batch: int, tile_b_max: int) -> int:
    b8 = _round_up(batch, 8)
    if b8 <= 256:
        # Single small tile; block shape == full array dims satisfies (8,128) rule.
        return b8
    # >= 2 grid steps (both v7x TensorCores busy); lane-dense (multiple of 128)
    # so the transposed-output store is unmasked.
    half = _round_up((b8 + 1) // 2, 128)
    return max(128, min(tile_b_max, half))


def classifier_forward(x, params, tile_b: int = 8192, bf16_ew=None):
    """x: (B, ...) — flattened to (B, input_size) like x.view(x.size(0), -1)."""
    if bf16_ew is None:
        bf16_ew = _supports_bf16_vpu()

    B = x.shape[0]
    x2d = x.reshape(B, -1).astype(jnp.bfloat16)
    in_f = x2d.shape[1]

    (w1, b1), (w2, b2), (w3, b3), (w4, b4) = params
    n_classes = w4.shape[1]
    nc_pad = _round_up(n_classes, 8)          # sublane axis of transposed output

    # Hidden-layer biases in the elementwise dtype; final bias as a column (nc, 1).
    bias_dtype = jnp.bfloat16 if bf16_ew else jnp.float32
    b1k = b1.astype(bias_dtype)
    b2k = b2.astype(bias_dtype)
    b3k = b3.astype(bias_dtype)

    # Final layer pre-transposed + sublane-padded: (nc_pad, 16) bf16, bias (nc_pad, 1) f32.
    w4t = jnp.pad(w4.T.astype(jnp.bfloat16), ((0, nc_pad - n_classes), (0, 0)))
    b4t = jnp.pad(b4.reshape(-1, 1).astype(jnp.float32),
                  ((0, nc_pad - n_classes), (0, 0)))

    tile_b = _choose_tile_b(B, tile_b)
    B_pad = _round_up(B, tile_b)
    if B_pad != B:
        x2d = jnp.pad(x2d, ((0, B_pad - B), (0, 0)))
    grid = (B_pad // tile_b,)

    weights = (w1.astype(jnp.bfloat16), b1k,
               w2.astype(jnp.bfloat16), b2k,
               w3.astype(jnp.bfloat16), b3k,
               w4t, b4t)

    def resident(a):
        return pl.BlockSpec(a.shape, lambda i: (0, 0))

    flops = 2 * B_pad * (in_f * 64 + 64 * 64 + 64 * 16 + 16 * nc_pad)
    bytes_accessed = (int(x2d.size) * 2
                      + sum(int(a.size) * a.dtype.itemsize for a in weights)
                      + B_pad * nc_pad * 4)

    out_t = pl.pallas_call(
        functools.partial(mlp_kernel, bf16_ew=bf16_ew),
        out_shape=jax.ShapeDtypeStruct((nc_pad, B_pad), jnp.float32),
        grid=grid,
        in_specs=[pl.BlockSpec((tile_b, in_f), lambda i: (i, 0))]
                 + [resident(a) for a in weights],
        out_specs=pl.BlockSpec((nc_pad, tile_b), lambda i: (0, i)),
        compiler_params=pltpu.CompilerParams(
            dimension_semantics=("parallel",),
            vmem_limit_bytes=32 * 1024 * 1024),
        cost_estimate=pl.CostEstimate(flops=flops, transcendentals=0,
                                      bytes_accessed=bytes_accessed),
    )(x2d, *weights)

    # Tiny (n_classes, B) slab -> (B, n_classes); padded rows / classes dropped.
    return out_t[:n_classes, :B].T


def init_params(key, input_size, n_classes):
    """Deterministic synthetic init. Weights (in, out) bf16, biases f32 (1, out)."""
    dims = [(input_size, 64), (64, 64), (64, 16), (16, n_classes)]
    params = []
    for i, (fan_in, fan_out) in enumerate(dims):
        kw, kb = jax.random.split(jax.random.fold_in(key, i))
        bound = 1.0 / jnp.sqrt(fan_in)
        w = jax.random.uniform(kw, (fan_in, fan_out), jnp.float32, -bound, bound)
        b = jax.random.uniform(kb, (1, fan_out), jnp.float32, -bound, bound)
        params.append((w.astype(jnp.bfloat16), b))
    return params


def reference_forward(x, params, bf16_ew):
    """Pure-JAX reference with the same mixed-precision policy as the kernel."""
    h = x.reshape(x.shape[0], -1).astype(jnp.bfloat16)
    (w1, b1), (w2, b2), (w3, b3), (w4, b4) = params

    def hidden(h, w, b):
        y = jnp.dot(h, w, preferred_element_type=jnp.float32)
        if bf16_ew:
            y = y.astype(jnp.bfloat16) + b.astype(jnp.bfloat16)
            return jnp.maximum(y, 0.0)
        return jnp.maximum(y + b, 0.0).astype(jnp.bfloat16)

    h = hidden(h, w1, b1)
    h = hidden(h, w2, b2)
    h = hidden(h, w3, b3)
    return jnp.dot(h, w4, preferred_element_type=jnp.float32) + b4.astype(jnp.float32)


if __name__ == "__main__":
    # scaler.mean_.shape[0] / len(label_encoder.classes_) are unknown at script
    # time; pick small consistent synthetic sizes.
    input_size = 32
    n_classes = 8

    key = jax.random.PRNGKey(0)
    kx, kp = jax.random.split(key)
    params = init_params(kp, input_size, n_classes)
    bf16_ew = _supports_bf16_vpu()

    # Run 1: batch exactly one small tile.
    x = jax.random.normal(kx, (8, input_size), dtype=jnp.float32)
    out = jax.block_until_ready(classifier_forward(x, params))
    ref = reference_forward(x, params, bf16_ew)
    assert out.shape == (8, n_classes)
    assert jnp.allclose(out, ref, atol=5e-3, rtol=5e-3), "mismatch vs reference (run 1)"

    # Run 2: batch not a multiple of 8 -> exercises batch padding + output slicing.
    x2 = jax.random.normal(jax.random.fold_in(kx, 1), (20, input_size), dtype=jnp.float32)
    out2 = jax.block_until_ready(classifier_forward(x2, params))
    ref2 = reference_forward(x2, params, bf16_ew)
    assert out2.shape == (20, n_classes)
    assert jnp.allclose(out2, ref2, atol=5e-3, rtol=5e-3), "mismatch vs reference (run 2)"

    # Run 3: batch large enough to force >= 2 grid steps (multi-tile pipeline path).
    x3 = jax.random.normal(jax.random.fold_in(kx, 2), (400, input_size), dtype=jnp.float32)
    out3 = jax.block_until_ready(classifier_forward(x3, params))
    ref3 = reference_forward(x3, params, bf16_ew)
    assert out3.shape == (400, n_classes)
    assert jnp.allclose(out3, ref3, atol=5e-3, rtol=5e-3), "mismatch vs reference (run 3)"

    print("KERNEL_OK")
</pallas_src>

<mosaic_0001>
module attributes {stable_mosaic.version = 11 : i64} {
  func.func @mlp_kernel(%arg0: i32, %arg1: memref<8x32xbf16, #tpu.memory_space<vmem>>, %arg2: memref<32x64xbf16, #tpu.memory_space<vmem>>, %arg3: memref<1x64xf32, #tpu.memory_space<vmem>>, %arg4: memref<64x64xbf16, #tpu.memory_space<vmem>>, %arg5: memref<1x64xf32, #tpu.memory_space<vmem>>, %arg6: memref<64x16xbf16, #tpu.memory_space<vmem>>, %arg7: memref<1x16xf32, #tpu.memory_space<vmem>>, %arg8: memref<8x16xbf16, #tpu.memory_space<vmem>>, %arg9: memref<8x1xf32, #tpu.memory_space<vmem>>, %arg10: memref<8x8xf32, #tpu.memory_space<vmem>>) attributes {dimension_semantics = [#tpu.dimension_semantics<parallel>], iteration_bounds = array<i64: 1>, scalar_prefetch = 0 : i64, scratch_operands = 0 : i64, tpu.core_type = #tpu.core_type<tc>, window_params = [{transform_indices = @transform_0, window_bounds = array<i64: 8, 32>}, {pipeline_mode = #tpu.pipeline_mode<synchronous>, transform_indices = @transform_1, window_bounds = array<i64: 32, 64>}, {pipeline_mode = #tpu.pipeline_mode<synchronous>, transform_indices = @transform_2, window_bounds = array<i64: 1, 64>}, {pipeline_mode = #tpu.pipeline_mode<synchronous>, transform_indices = @transform_3, window_bounds = array<i64: 64, 64>}, {pipeline_mode = #tpu.pipeline_mode<synchronous>, transform_indices = @transform_4, window_bounds = array<i64: 1, 64>}, {pipeline_mode = #tpu.pipeline_mode<synchronous>, transform_indices = @transform_5, window_bounds = array<i64: 64, 16>}, {pipeline_mode = #tpu.pipeline_mode<synchronous>, transform_indices = @transform_6, window_bounds = array<i64: 1, 16>}, {pipeline_mode = #tpu.pipeline_mode<synchronous>, transform_indices = @transform_7, window_bounds = array<i64: 8, 16>}, {pipeline_mode = #tpu.pipeline_mode<synchronous>, transform_indices = @transform_8, window_bounds = array<i64: 8, 1>}, {transform_indices = @transform_9, window_bounds = array<i64: 8, 8>}]} {
    %c0 = arith.constant 0 : index
    %c0_0 = arith.constant 0 : index
    %0 = vector.load %arg1[%c0, %c0_0] : memref<8x32xbf16, #tpu.memory_space<vmem>>, vector<8x32xbf16>
    %c0_1 = arith.constant 0 : index
    %c0_2 = arith.constant 0 : index
    %1 = vector.load %arg2[%c0_1, %c0_2] : memref<32x64xbf16, #tpu.memory_space<vmem>>, vector<32x64xbf16>
    %cst = arith.constant dense<0.000000e+00> : vector<8x64xf32>
    %2 = tpu.matmul %0, %1, %cst {dimension_numbers = #tpu.dot_dimension_numbers<[1], [0], [0], [1], [0, 0, 1, 1], [], []>} : vector<8x32xbf16>, vector<32x64xbf16>, vector<8x64xf32> -> vector<8x64xf32>
    %c0_3 = arith.constant 0 : index
    %c0_4 = arith.constant 0 : index
    %3 = vector.load %arg3[%c0_3, %c0_4] : memref<1x64xf32, #tpu.memory_space<vmem>>, vector<1x64xf32>
    %4 = vector.broadcast %3 : vector<1x64xf32> to vector<8x64xf32>
    %5 = arith.addf %2, %4 : vector<8x64xf32>
    %cst_5 = arith.constant 0.000000e+00 : f32
    %6 = vector.broadcast %cst_5 : f32 to vector<8x64xf32>
    %7 = arith.maximumf %5, %6 : vector<8x64xf32>
    %8 = arith.truncf %7 : vector<8x64xf32> to vector<8x64xbf16>
    %c0_6 = arith.constant 0 : index
    %c0_7 = arith.constant 0 : index
    %9 = vector.load %arg4[%c0_6, %c0_7] : memref<64x64xbf16, #tpu.memory_space<vmem>>, vector<64x64xbf16>
    %cst_8 = arith.constant dense<0.000000e+00> : vector<8x64xf32>
    %10 = tpu.matmul %8, %9, %cst_8 {dimension_numbers = #tpu.dot_dimension_numbers<[1], [0], [0], [1], [0, 0, 1, 1], [], []>} : vector<8x64xbf16>, vector<64x64xbf16>, vector<8x64xf32> -> vector<8x64xf32>
    %c0_9 = arith.constant 0 : index
    %c0_10 = arith.constant 0 : index
    %11 = vector.load %arg5[%c0_9, %c0_10] : memref<1x64xf32, #tpu.memory_space<vmem>>, vector<1x64xf32>
    %12 = vector.broadcast %11 : vector<1x64xf32> to vector<8x64xf32>
    %13 = arith.addf %10, %12 : vector<8x64xf32>
    %cst_11 = arith.constant 0.000000e+00 : f32
    %14 = vector.broadcast %cst_11 : f32 to vector<8x64xf32>
    %15 = arith.maximumf %13, %14 : vector<8x64xf32>
    %16 = arith.truncf %15 : vector<8x64xf32> to vector<8x64xbf16>
    %c0_12 = arith.constant 0 : index
    %c0_13 = arith.constant 0 : index
    %17 = vector.load %arg6[%c0_12, %c0_13] : memref<64x16xbf16, #tpu.memory_space<vmem>>, vector<64x16xbf16>
    %cst_14 = arith.constant dense<0.000000e+00> : vector<8x16xf32>
    %18 = tpu.matmul %16, %17, %cst_14 {dimension_numbers = #tpu.dot_dimension_numbers<[1], [0], [0], [1], [0, 0, 1, 1], [], []>} : vector<8x64xbf16>, vector<64x16xbf16>, vector<8x16xf32> -> vector<8x16xf32>
    %c0_15 = arith.constant 0 : index
    %c0_16 = arith.constant 0 : index
    %19 = vector.load %arg7[%c0_15, %c0_16] : memref<1x16xf32, #tpu.memory_space<vmem>>, vector<1x16xf32>
    %20 = vector.broadcast %19 : vector<1x16xf32> to vector<8x16xf32>
    %21 = arith.addf %18, %20 : vector<8x16xf32>
    %cst_17 = arith.constant 0.000000e+00 : f32
    %22 = vector.broadcast %cst_17 : f32 to vector<8x16xf32>
    %23 = arith.maximumf %21, %22 : vector<8x16xf32>
    %24 = arith.truncf %23 : vector<8x16xf32> to vector<8x16xbf16>
    %c0_18 = arith.constant 0 : index
    %c0_19 = arith.constant 0 : index
    %25 = vector.load %arg8[%c0_18, %c0_19] : memref<8x16xbf16, #tpu.memory_space<vmem>>, vector<8x16xbf16>
    %cst_20 = arith.constant dense<0.000000e+00> : vector<8x8xf32>
    %26 = tpu.matmul %25, %24, %cst_20 {dimension_numbers = #tpu.dot_dimension_numbers<[1], [1], [0], [0], [0, 0, 1, 0], [], []>} : vector<8x16xbf16>, vector<8x16xbf16>, vector<8x8xf32> -> vector<8x8xf32>
    %c0_21 = arith.constant 0 : index
    %c0_22 = arith.constant 0 : index
    %27 = vector.load %arg9[%c0_21, %c0_22] : memref<8x1xf32, #tpu.memory_space<vmem>>, vector<8x1xf32>
    %28 = vector.broadcast %27 : vector<8x1xf32> to vector<8x8xf32>
    %29 = arith.addf %26, %28 : vector<8x8xf32>
    %c0_23 = arith.constant 0 : index
    %c0_24 = arith.constant 0 : index
    %30 = vector.load %arg10[%c0_23, %c0_24] : memref<8x8xf32, #tpu.memory_space<vmem>>, vector<8x8xf32>
    tpu.vector_store %arg10[%c0_23, %c0_24], %29 {strides = array<i32>} : memref<8x8xf32, #tpu.memory_space<vmem>>, vector<8x8xf32>,
    return
  }
  func.func @transform_0(%arg0: i32) -> (i32, i32) {
    %c0_i32 = arith.constant 0 : i32
    %c0_i32_0 = arith.constant 0 : i32
    return %arg0, %c0_i32 : i32, i32
  }
  func.func @transform_1(%arg0: i32) -> (i32, i32) {
    %c0_i32 = arith.constant 0 : i32
    %c0_i32_0 = arith.constant 0 : i32
    %c0_i32_1 = arith.constant 0 : i32
    return %c0_i32, %c0_i32_0 : i32, i32
  }
  func.func @transform_2(%arg0: i32) -> (i32, i32) {
    %c0_i32 = arith.constant 0 : i32
    %c0_i32_0 = arith.constant 0 : i32
    %c0_i32_1 = arith.constant 0 : i32
    return %c0_i32, %c0_i32_0 : i32, i32
  }
  func.func @transform_3(%arg0: i32) -> (i32, i32) {
    %c0_i32 = arith.constant 0 : i32
    %c0_i32_0 = arith.constant 0 : i32
    %c0_i32_1 = arith.constant 0 : i32
    return %c0_i32, %c0_i32_0 : i32, i32
  }
  func.func @transform_4(%arg0: i32) -> (i32, i32) {
    %c0_i32 = arith.constant 0 : i32
    %c0_i32_0 = arith.constant 0 : i32
    %c0_i32_1 = arith.constant 0 : i32
    return %c0_i32, %c0_i32_0 : i32, i32
  }
  func.func @transform_5(%arg0: i32) -> (i32, i32) {
    %c0_i32 = arith.constant 0 : i32
    %c0_i32_0 = arith.constant 0 : i32
    %c0_i32_1 = arith.constant 0 : i32
    return %c0_i32, %c0_i32_0 : i32, i32
  }
  func.func @transform_6(%arg0: i32) -> (i32, i32) {
    %c0_i32 = arith.constant 0 : i32
    %c0_i32_0 = arith.constant 0 : i32
    %c0_i32_1 = arith.constant 0 : i32
    return %c0_i32, %c0_i32_0 : i32, i32
  }
  func.func @transform_7(%arg0: i32) -> (i32, i32) {
    %c0_i32 = arith.constant 0 : i32
    %c0_i32_0 = arith.constant 0 : i32
    %c0_i32_1 = arith.constant 0 : i32
    return %c0_i32, %c0_i32_0 : i32, i32
  }
  func.func @transform_8(%arg0: i32) -> (i32, i32) {
    %c0_i32 = arith.constant 0 : i32
    %c0_i32_0 = arith.constant 0 : i32
    %c0_i32_1 = arith.constant 0 : i32
    return %c0_i32, %c0_i32_0 : i32, i32
  }
  func.func @transform_9(%arg0: i32) -> (i32, i32) {
    %c0_i32 = arith.constant 0 : i32
    %c0_i32_0 = arith.constant 0 : i32
    return %c0_i32, %arg0 : i32, i32
  }
}

</mosaic_0001>

<bundles_post_ra>
// kernel: tpu_custom_call.1
= control target key start
LH: loop header
LB: loop body
LE: loop exit
PB: predicated region body
PF: predicated region fallthrough
CT: control target
= control target key end

     0   :  { %14 = vsyncpa [#allocation3], 0  ;;  %s668_s0 = inlined_call_operand.vmem [shape: bf16[8,32], index: 0, kind: input, shape index: {}]   ;;  %s669_s1 = inlined_call_operand.vmem [shape: bf16[32,64], index: 1, kind: input, shape index: {}]   ;;  %s670_s2 = inlined_call_operand.hbm [shape: f32[1,64], index: 2, kind: input, shape index: {}]   ;;  %s671_s3 = inlined_call_operand.vmem [shape: bf16[64,64], index: 3, kind: input, shape index: {}]   ;;  %s672_s4 = inlined_call_operand.hbm [shape: f32[1,64], index: 4, kind: input, shape index: {}]   ;;  %s673_s5 = inlined_call_operand.vmem [shape: bf16[64,16], index: 5, kind: input, shape index: {}]   ;;  %s674_s6 = inlined_call_operand.vmem [shape: f32[1,16], index: 6, kind: input, shape index: {}]   ;;  %s675_s7 = inlined_call_operand.vmem [shape: bf16[8,16], index: 7, kind: input, shape index: {}]   ;;  %s676_s8 = inlined_call_operand.vmem [shape: f32[8,1], index: 8, kind: input, shape index: {}]   ;;  %s677_s9 = inlined_call_operand.hbm [shape: f32[8,8], index: 9, kind: output, shape index: {}]  }
   0x1   :  { %15 = vsyncpa [#allocation6], 0 }
   0x2   :  { %16 = vsyncpa [#allocation4], 0  ;;  %s528_s30 = smov [#allocation2]   ;;  %s529_s11 = smov [#allocation5]  }
   0x3   :  { %s27_s10 = sshll.u32 %s528_s30, 4  ;;  %s39_s12 = sshll.u32 %s529_s11, 4  ;;  %s28_s10 = int_to_ptr.vmem [resolvable:$true] %s27_s10  ;;  %s40_s12 = int_to_ptr.vmem [resolvable:$true] %s39_s12 }
   0x4   :  { %s456_s15 = scalar_lea.hbm %s670_s2, 16 }
   0x5   :  { %p457_p0 = scmp.ne.s32.totalorder %s670_s2, %s456_s15  ;;  %p460_p1 = scmp.lt.u32.totalorder %s456_s15, %s670_s2 }
   0x7   :  { %p462_p2 = pnand %p460_p1, %p457_p0 }
   0x9   :  { %465 = shalt.err (!%p462_p2)
}
   0xa   :  { %s466_s20 = scalar_lea.vmem %s28_s10, 16  ;;  %s470_s21 = scalar_lea.vmem %s28_s10, 32 }
   0xb   :  { %p467_p3 = scmp.ne.s32.totalorder %s28_s10, %s466_s20  ;;  %p471_p4 = scmp.lt.s32.totalorder %s28_s10, %s28_s10 }
   0xc   :  { %p472_p5 = scmp.lt.s32.totalorder %s470_s21, %s466_s20 }
   0xe   :  { %p473_p6 = por %p472_p5, %p471_p4 }
  0x10   :  { %p474_p7 = pnand %p473_p6, %p467_p3 }
  0x12   :  { %477 = shalt.err (!%p474_p7)
}
  0x13   :  { %30 = dma.hbm_to_vmem [thread:$0]  %s670_s2, 16, %s28_s10, [#allocation3]  }
  0x14   :  { %s478_s26 = scalar_lea.hbm %s672_s4, 16 }
  0x15   :  { %p479_p8 = scmp.ne.s32.totalorder %s672_s4, %s478_s26  ;;  %p482_p9 = scmp.lt.u32.totalorder %s478_s26, %s672_s4 }
  0x17   :  { %p484_p10 = pnand %p482_p9, %p479_p8 }
  0x19   :  { %487 = shalt.err (!%p484_p10)
}
  0x1a   :  { %s488_s11 = scalar_lea.vmem %s40_s12, 16  ;;  %s492_s13 = scalar_lea.vmem %s40_s12, 32 }
  0x1b   :  { %p489_p11 = scmp.ne.s32.totalorder %s40_s12, %s488_s11  ;;  %p493_p12 = scmp.lt.s32.totalorder %s40_s12, %s40_s12 }
  0x1c   :  { %p494_p13 = scmp.lt.s32.totalorder %s492_s13, %s488_s11 }
  0x1e   :  { %p495_p0 = por %p494_p13, %p493_p12 }
  0x20   :  { %p496_p1 = pnand %p495_p0, %p489_p11 }
  0x22   :  { %499 = shalt.err (!%p496_p1)
}
  0x23   :  { %42 = dma.hbm_to_vmem [thread:$0]  %s672_s4, 16, %s40_s12, [#allocation6]  }
  0x24   :  { %522 = dma.done.wait [#allocation3], 16  }
  0x25   :  { %523 = vsyncadd [#allocation3], 4294967280 }
  0x26   :  { %524 = dma.done.wait [#allocation6], 16  }
  0x27   :  { %525 = vsyncadd [#allocation6], 4294967280  ;;  %v530_v0 = vmov 0.0   ;;  %vm531_vm0 = vmmov 0   ;;  %v446_v1 = vld [vmem:[%s669_s1] sm:$0xff]   ;;  %v447_v2 = vld [vmem:[%s669_s1 + $0x8] sm:$0xff]  }
  0x28   :  { %401 = vmatprep.subr.bf16.mxu0 %v530_v0  ;;  %405 = vmatprep.mubr.msk.bf16.mxu0 %vm531_vm0, %v530_v0  ;;  %v448_v3 = vld [vmem:[%s671_s3] sm:$0xff]   ;;  %vm82_vm1 = vcmask 261120   ;;  %v449_v5 = vld [vmem:[%s671_s3 + $0x8] sm:$0xff]   ;;  %v450_v6 = vld [vmem:[%s671_s3 + $0x10] sm:$0xff]   ;;  %vm167_vm2 = vcmask 523264   ;;  %v532_v29 = vmov 0  }
  0x29   :  { %409 = vmatprep.subr.bf16.mxu1 %v530_v0  ;;  %417 = vmatprep.mubr.msk.bf16.mxu1 %vm531_vm0, %v530_v0  ;;  %v58_v4 = vld [vmem:[%s668_s0] sm:$0xf]  ;;  %v451_v7 = vld [vmem:[%s671_s3 + $0x18] sm:$0xff]   ;;  %v453_v9 = vld [vmem:[%s673_s5 + $0x8] sm:$0xff]   ;;  %vm304_vm3 = vcmask 130048   ;;  %vm351_vm4 = vcmask 64512  }
  0x2a   :  { %402 = vmatpush3.bf16.msra.mxu0 %v446_v1  ;;  %410 = vmatpush3.bf16.msra.mxu1 %v448_v3  ;;  %v452_v8 = vld [vmem:[%s673_s5] sm:$0xff]   ;;  %v454_v18 = vld [vmem:[%s673_s5 + $0x10] sm:$0xff]   ;;  %v455_v19 = vld [vmem:[%s673_s5 + $0x18] sm:$0xff]  }
  0x2b   :  { %403 = vmatprep.subr.bf16.mxu0 %v530_v0  ;;  %411 = vmatprep.subr.bf16.mxu1 %v530_v0  ;;  %v369_v10 = vld [vmem:[#allocation2] ss:$0 sm:$0xff]  ;;  %v373_v20 = vld [vmem:[#allocation5] ss:$0 sm:$0xff] }
  0x2c   :  { %v298_v28 = vld [vmem:[%s676_s8] sm:$0xff]  ;;  %445 = vset.pattern.permute.xlu0 %v532_v29  ;;  %s533_s8 = smov [#allocation7]  }
  0x2d   :  { %301 = vperm.xlu0 %445, %v298_v28   ;;  %v379_v30 = vld [vmem:[%s674_s6] ss:$0 sm:$0xff]  ;;  %s359_s15 = sshll.u32 %s533_s8, 4  ;;  %s360_s15 = int_to_ptr.vmem [resolvable:$true] %s359_s15 }
  0x2e   :  { %404 = vmatpush3.bf16.msra.mxu0 %v447_v2  ;;  %412 = vmatpush3.bf16.msra.mxu1 %v449_v5  ;;  %v297_v39 = vld [vmem:[%s675_s7] sm:$0xf]  ;;  %s500_s6 = scalar_lea.vmem %s360_s15, 128  ;;  %p505_p3 = scmp.lt.s32.totalorder %s360_s15, %s360_s15 }
  0x2f   :  { %421 = vmatprep.subr.bf16.mxu0 %v530_v0  ;;  %413 = vmatprep.subr.bf16.mxu1 %v530_v0  ;;  %p501_p2 = scmp.ne.s32.totalorder %s360_s15, %s500_s6  ;;  %p506_p4 = scmp.lt.s32.totalorder %s500_s6, %s500_s6 }
  0x31   :  { %406 = vmatmul.mubr.msk.bf16.vlgmr.msra.gmra.mrb[0].mxu0 %vm82_vm1, %v58_v4  ;;  %p507_p5 = por %p506_p4, %p505_p3 }
  0x32   :  { %429 = vmatprep.mubr.msk.bf16.mxu0 %vm531_vm0, %v530_v0  ;;  %414 = vmatpush3.bf16.msra.mxu1 %v450_v6 }
  0x33   :  { %415 = vmatprep.subr.bf16.mxu1 %v530_v0  ;;  %422 = vmatpush3.bf16.msra.mxu0 %v452_v8  ;;  %p508_p6 = pnand %p507_p5, %p501_p2 }
  0x34   :  { %423 = vmatprep.subr.bf16.mxu0 %v530_v0 }
  0x36   :  { %416 = vmatpush3.bf16.msra.mxu1 %v451_v7 }
  0x37   :  { %433 = vmatprep.subr.bf16.mxu1 %v530_v0  ;;  %424 = vmatpush3.bf16.msra.mxu0 %v453_v9 }
  0x38   :  { %425 = vmatprep.subr.bf16.mxu0 %v530_v0 }
  0x3b   :  { %426 = vmatpush3.bf16.msra.mxu0 %v454_v18 }
  0x3c   :  { %427 = vmatprep.subr.bf16.mxu0 %v530_v0 }
  0x3f   :  { %428 = vmatpush3.bf16.msra.mxu0 %v455_v19 }
  0xac   :  { %v302_v40 = vpop.permute.xlu0 %301 }
 0x104   :  { %v120_v11 = vpop.f32.mrb[0].mxu0 }
 0x105   :  { %v121_v12 = vadd.f32 %v369_v10, %v120_v11  ;;  %v407_v13 = vpop.f32.mrb[1].mxu0 }
 0x106   :  { %v123_v14 = vpop.f32.mrb[2].mxu0 }
 0x107   :  { %v126_v15 = vmax.f32 %v121_v12, 0.0  ;;  %v408_v16 = vpop.f32.mrb[3].mxu0 }
 0x109   :  { %v127_v17 = vpack.c.bf16 %v126_v15, %v126_v15 }
 0x10b   :  { %418 = vmatmul.mubr.msk.bf16.vlgmr.msra.gmra.mrb[0].mxu1 %vm167_vm2, %v127_v17 }
 0x10c   :  { %435 = vmatprep.mubr.msk.bf16.mxu1 %vm531_vm0, %v530_v0 }
 0x1de   :  { %v205_v21 = vpop.f32.mrb[0].mxu1 }
 0x1df   :  { %v206_v22 = vadd.f32 %v373_v20, %v205_v21  ;;  %v419_v23 = vpop.f32.mrb[1].mxu1 }
 0x1e0   :  { %v208_v24 = vpop.f32.mrb[2].mxu1 }
 0x1e1   :  { %v211_v25 = vmax.f32 %v206_v22, 0.0  ;;  %v420_v26 = vpop.f32.mrb[3].mxu1 }
 0x1e3   :  { %v212_v27 = vpack.c.bf16 %v211_v25, %v211_v25 }
 0x1e5   :  { %430 = vmatmul.mubr.msk.bf16.vlgmr.msra.gmra.mrb[4].mxu0 %vm167_vm2, %v212_v27 }
 0x2b8   :  { %v289_v31 = vpop.f32.mrb[4].mxu0 }
 0x2b9   :  { %v290_v32 = vadd.f32 %v379_v30, %v289_v31  ;;  %v431_v33 = vpop.f32.mrb[5].mxu0 }
 0x2ba   :  { %v292_v34 = vpop.f32.mrb[6].mxu0 }
 0x2bb   :  { %v295_v35 = vmax.f32 %v290_v32, 0.0  ;;  %v432_v36 = vpop.f32.mrb[7].mxu0 }
 0x2bd   :  { %v296_v37 = vpack.c.bf16 %v295_v35, %v295_v35 }
 0x2bf   :  { %v309_v38 = vsel %vm304_vm3, %v296_v37, 0 }
 0x2c0   :  { %434 = vmatpush3.bf16.xpose.msra.mxu1 %v309_v38 }
 0x2c7   :  { %436 = vmatmul.mubr.msk.bf16.vlgmr.msra.gmra.mrb[4].mxu1 %vm304_vm3, %v297_v39 }
 0x39a   :  { %v345_v41 = vpop.f32.mrb[4].mxu1 }
 0x39b   :  { %v346_v42 = vadd.f32 %v345_v41, %v302_v40  ;;  %v437_v43 = vpop.f32.mrb[5].mxu1 }
 0x39c   :  { %v348_v44 = vpop.f32.mrb[6].mxu1 }
 0x39d   :  { %v438_v45 = vpop.f32.mrb[7].mxu1  ;;  %352 = vst.msk [vmem:[#allocation7] sm:$0xff] %vm351_vm4, %v346_v42 }
 0x39e   :  { %511 = shalt.err (!%p508_p6)
}
 0x39f   :  { %s512_s17 = scalar_lea.hbm %s677_s9, 128 }
 0x3a0   :  { %p513_p7 = scmp.ne.s32.totalorder %s677_s9, %s512_s17  ;;  %p516_p8 = scmp.lt.u32.totalorder %s512_s17, %s677_s9 }
 0x3a2   :  { %p518_p9 = pnand %p516_p8, %p513_p7 }
 0x3a4   :  { %521 = shalt.err (!%p518_p9)
}
 0x3a5   :  { %362 = dma.vmem_to_hbm [thread:$0]  %s360_s15, 128, %s677_s9, [#allocation4]  }
 0x3a6   :  { %526 = dma.done.wait [#allocation4], 128  }
 0x3a7   :  { %527 = vsyncadd [#allocation4], 4294967168 }
 0x3a8   :  { %366 = vsyncpa [#allocation3], 1 }
 0x3a9   :  { %367 = vsyncpa [#allocation6], 1 }
 0x3aa   :  { %368 = vsyncpa [#allocation4], 1 }

</bundles_post_ra>
